<compile_context>
chip_gen: v7x
topology: tpu7x:2x2x1
jax: 0.10.0
libtpu: 0.0.40
codegen_flags: <defaults>
</compile_context>

<pallas_src>
import math

import jax
import jax.numpy as jnp
from jax import lax
from jax.experimental import pallas as pl
from jax.experimental.pallas import tpu as pltpu

_ITEM = 4                       # f32 bytes
_BLOCK_BUDGET = 40 * 1024 * 1024  # per-step double-buffered block budget


def _block_footprint(bblk, L, C, dblk):
    out_b = 2 * bblk * L * dblk * _ITEM   # double-buffered output block
    in_b = 2 * bblk * L * C * _ITEM       # double-buffered input block
    w_b = 2 * 3 * C * dblk * _ITEM        # weight block
    return out_b + in_b + w_b


def _pick_bblk(B, L, C, D):
    """Largest divisor of B that fits the VMEM budget and keeps >=2 grid steps."""
    per_elem = 2 * L * (D + C) * _ITEM
    max_vmem = max(1, _BLOCK_BUDGET // max(per_elem, 1))
    max_steps = (B + 1) // 2 if B >= 2 else 1   # >=2 steps -> v7x dual-TC sharding
    bblk = int(max(1, min(B, max_vmem, max_steps)))
    while B % bblk:
        bblk -= 1
    return bblk


def _pick_dblk(D, bblk, L, C):
    """Full D when it fits; otherwise a lane-dense (multiple-of-128) divisor of D."""
    def fits(dblk):
        return _block_footprint(bblk, L, C, dblk) <= _BLOCK_BUDGET
    if fits(D) or (D % 128 != 0):
        return D
    n = D // 128
    for m in range(n, 0, -1):
        if n % m == 0 and fits(m * 128):
            return m * 128
    return 128


def _make_kernel(bblk, L):
    def kernel(x_ref, w_ref, o_ref):
        # x_ref: (bblk, L, C)   w_ref: (3, C, Dblk)   o_ref: (bblk, L, Dblk)
        w0 = w_ref[0]          # (C, Dblk)  tap k=0
        w1 = w_ref[1]          # (C, Dblk)  tap k=1
        w2 = w_ref[2]          # (C, Dblk)  tap k=2
        for b in range(bblk):  # static unroll; every op below is on 2-D tiles
            xb = x_ref[b]                                   # (L, C)
            # Circular shifts along the sequence (sublane) axis, per batch element.
            x_prev = pltpu.roll(xb, 1, axis=0)              # row t = x[(t-1) mod L]
            x_next = pltpu.roll(xb, L - 1, axis=0)          # row t = x[(t+1) mod L]
            acc = jnp.dot(x_prev, w0, preferred_element_type=jnp.float32)
            acc = acc + jnp.dot(xb, w1, preferred_element_type=jnp.float32)
            acc = acc + jnp.dot(x_next, w2, preferred_element_type=jnp.float32)
            o_ref[b] = acc.astype(o_ref.dtype)
    return kernel


def token_embedding(x, weight, *, block_batch=None, block_d=None):
    """Equivalent of TokenEmbedding(c_in, d_model).forward(x).

    Args:
      x:      (batch, seq, c_in) float32.
      weight: (d_model, c_in, 3) float32 — PyTorch nn.Conv1d weight layout (O, I, K).
    Returns:
      (batch, seq, d_model) in x.dtype.
    """
    B, L, C = x.shape
    D, C_w, K = weight.shape
    assert C_w == C, "weight in_channels must match x"
    assert K == 3, "TokenEmbedding uses kernel_size=3"

    # One-time layout work hoisted out of the kernel: (O, I, K) -> (K, I, O).
    w_taps = jnp.transpose(weight, (2, 1, 0)).astype(jnp.float32)   # (3, C, D)

    bblk = block_batch if block_batch is not None else _pick_bblk(B, L, C, D)
    dblk = block_d if block_d is not None else _pick_dblk(D, bblk, L, C)
    assert B % bblk == 0 and D % dblk == 0

    grid = (B // bblk, D // dblk)

    cp_kwargs = dict(dimension_semantics=("parallel", "parallel"))
    footprint = _block_footprint(bblk, L, C, dblk)
    if footprint > (16 << 20):   # only raise the scoped limit when actually needed
        cp_kwargs["vmem_limit_bytes"] = int(min(max(footprint + (8 << 20), 32 << 20),
                                                56 << 20))

    return pl.pallas_call(
        _make_kernel(bblk, L),
        out_shape=jax.ShapeDtypeStruct((B, L, D), x.dtype),
        grid=grid,
        in_specs=[
            # bblk batch elements per step, full sequence & channels.
            pl.BlockSpec((bblk, L, C), lambda b, d: (b, 0, 0)),
            # Weight taps: constant across batch steps, sliced along D.
            pl.BlockSpec((3, C, dblk), lambda b, d: (0, 0, d)),
        ],
        out_specs=pl.BlockSpec((bblk, L, dblk), lambda b, d: (b, 0, d)),
        compiler_params=pltpu.CompilerParams(**cp_kwargs),
    )(x, w_taps)


if __name__ == "__main__":
    key = jax.random.PRNGKey(0)
    k_x, k_w = jax.random.split(key)

    # Small shapes; batch=4 exercises batch-blocking (bblk=2 -> 2 grid steps).
    batch, seq, c_in, d_model = 4, 8, 4, 128

    x = jax.random.normal(k_x, (batch, seq, c_in), dtype=jnp.float32)

    # Conv1d weight in PyTorch layout (O, I, K); kaiming_normal_-like init done
    # host-side (initialization lives in __init__, not forward).
    fan_in = c_in * 3
    gain = math.sqrt(2.0 / (1.0 + 0.01 ** 2))
    std = gain / math.sqrt(fan_in)
    weight = std * jax.random.normal(k_w, (d_model, c_in, 3), dtype=jnp.float32)

    out = jax.block_until_ready(token_embedding(x, weight))

    # Independent pure-JAX reference: circular pad by 1 each side + VALID conv,
    # exactly nn.Conv1d(padding=1, padding_mode='circular', bias=False).
    x_perm = jnp.transpose(x, (0, 2, 1))                                   # (B, C, L)
    x_pad = jnp.concatenate([x_perm[:, :, -1:], x_perm, x_perm[:, :, :1]], axis=-1)
    ref = lax.conv_general_dilated(
        x_pad, weight,
        window_strides=(1,), padding="VALID",
        dimension_numbers=("NCH", "OIH", "NCH"),
        precision=lax.Precision.HIGHEST)
    ref = jnp.transpose(ref, (0, 2, 1))                                    # (B, L, D)

    assert out.shape == (batch, seq, d_model)
    assert out.dtype == jnp.float32
    assert jnp.allclose(out, ref, atol=1e-4, rtol=1e-4), "mismatch vs reference"

    print("KERNEL_OK")
</pallas_src>

<mosaic_0001>
module attributes {stable_mosaic.version = 11 : i64} {
  func.func @kernel(%arg0: i32, %arg1: i32, %arg2: memref<2x8x4xf32, #tpu.memory_space<vmem>>, %arg3: memref<3x4x128xf32, #tpu.memory_space<vmem>>, %arg4: memref<2x8x128xf32, #tpu.memory_space<vmem>>) attributes {dimension_semantics = [#tpu.dimension_semantics<parallel>, #tpu.dimension_semantics<parallel>], iteration_bounds = array<i64: 2, 1>, scalar_prefetch = 0 : i64, scratch_operands = 0 : i64, tpu.core_type = #tpu.core_type<tc>, window_params = [{transform_indices = @transform_0, window_bounds = array<i64: 2, 8, 4>}, {transform_indices = @transform_1, window_bounds = array<i64: 3, 4, 128>}, {transform_indices = @transform_2, window_bounds = array<i64: 2, 8, 128>}]} {
    %c0 = arith.constant 0 : index
    %c0_0 = arith.constant 0 : index
    %c0_1 = arith.constant 0 : index
    %0 = vector.load %arg3[%c0, %c0_0, %c0_1] : memref<3x4x128xf32, #tpu.memory_space<vmem>>, vector<1x4x128xf32>
    %1 = vector.shape_cast %0 : vector<1x4x128xf32> to vector<4x128xf32>
    %c1 = arith.constant 1 : index
    %c0_2 = arith.constant 0 : index
    %c0_3 = arith.constant 0 : index
    %2 = vector.load %arg3[%c1, %c0_2, %c0_3] : memref<3x4x128xf32, #tpu.memory_space<vmem>>, vector<1x4x128xf32>
    %3 = vector.shape_cast %2 : vector<1x4x128xf32> to vector<4x128xf32>
    %c2 = arith.constant 2 : index
    %c0_4 = arith.constant 0 : index
    %c0_5 = arith.constant 0 : index
    %4 = vector.load %arg3[%c2, %c0_4, %c0_5] : memref<3x4x128xf32, #tpu.memory_space<vmem>>, vector<1x4x128xf32>
    %5 = vector.shape_cast %4 : vector<1x4x128xf32> to vector<4x128xf32>
    %c0_6 = arith.constant 0 : index
    %c0_7 = arith.constant 0 : index
    %c0_8 = arith.constant 0 : index
    %6 = vector.load %arg2[%c0_6, %c0_7, %c0_8] : memref<2x8x4xf32, #tpu.memory_space<vmem>>, vector<1x8x4xf32>
    %7 = vector.shape_cast %6 : vector<1x8x4xf32> to vector<8x4xf32>
    %c1_i32 = arith.constant 1 : i32
    %8 = tpu.dynamic_rotate %7 by %c1_i32 dim 0 : vector<8x4xf32>, i32 -> vector<8x4xf32>
    %c7_i32 = arith.constant 7 : i32
    %9 = tpu.dynamic_rotate %7 by %c7_i32 dim 0 : vector<8x4xf32>, i32 -> vector<8x4xf32>
    %cst = arith.constant dense<0.000000e+00> : vector<8x128xf32>
    %10 = tpu.matmul %8, %1, %cst {dimension_numbers = #tpu.dot_dimension_numbers<[1], [0], [0], [1], [0, 0, 1, 1], [], []>} : vector<8x4xf32>, vector<4x128xf32>, vector<8x128xf32> -> vector<8x128xf32>
    %cst_9 = arith.constant dense<0.000000e+00> : vector<8x128xf32>
    %11 = tpu.matmul %7, %3, %cst_9 {dimension_numbers = #tpu.dot_dimension_numbers<[1], [0], [0], [1], [0, 0, 1, 1], [], []>} : vector<8x4xf32>, vector<4x128xf32>, vector<8x128xf32> -> vector<8x128xf32>
    %12 = arith.addf %10, %11 : vector<8x128xf32>
    %cst_10 = arith.constant dense<0.000000e+00> : vector<8x128xf32>
    %13 = tpu.matmul %9, %5, %cst_10 {dimension_numbers = #tpu.dot_dimension_numbers<[1], [0], [0], [1], [0, 0, 1, 1], [], []>} : vector<8x4xf32>, vector<4x128xf32>, vector<8x128xf32> -> vector<8x128xf32>
    %14 = arith.addf %12, %13 : vector<8x128xf32>
    %c0_11 = arith.constant 0 : index
    %c0_12 = arith.constant 0 : index
    %c0_13 = arith.constant 0 : index
    %15 = vector.load %arg4[%c0_11, %c0_12, %c0_13] : memref<2x8x128xf32, #tpu.memory_space<vmem>>, vector<1x8x128xf32>
    %16 = vector.shape_cast %15 : vector<1x8x128xf32> to vector<8x128xf32>
    %17 = vector.shape_cast %14 : vector<8x128xf32> to vector<1x8x128xf32>
    tpu.vector_store %arg4[%c0_11, %c0_12, %c0_13], %17 {strides = array<i32>} : memref<2x8x128xf32, #tpu.memory_space<vmem>>, vector<1x8x128xf32>,
    %c1_14 = arith.constant 1 : index
    %c0_15 = arith.constant 0 : index
    %c0_16 = arith.constant 0 : index
    %18 = vector.load %arg2[%c1_14, %c0_15, %c0_16] : memref<2x8x4xf32, #tpu.memory_space<vmem>>, vector<1x8x4xf32>
    %19 = vector.shape_cast %18 : vector<1x8x4xf32> to vector<8x4xf32>
    %c1_i32_17 = arith.constant 1 : i32
    %20 = tpu.dynamic_rotate %19 by %c1_i32_17 dim 0 : vector<8x4xf32>, i32 -> vector<8x4xf32>
    %c7_i32_18 = arith.constant 7 : i32
    %21 = tpu.dynamic_rotate %19 by %c7_i32_18 dim 0 : vector<8x4xf32>, i32 -> vector<8x4xf32>
    %cst_19 = arith.constant dense<0.000000e+00> : vector<8x128xf32>
    %22 = tpu.matmul %20, %1, %cst_19 {dimension_numbers = #tpu.dot_dimension_numbers<[1], [0], [0], [1], [0, 0, 1, 1], [], []>} : vector<8x4xf32>, vector<4x128xf32>, vector<8x128xf32> -> vector<8x128xf32>
    %cst_20 = arith.constant dense<0.000000e+00> : vector<8x128xf32>
    %23 = tpu.matmul %19, %3, %cst_20 {dimension_numbers = #tpu.dot_dimension_numbers<[1], [0], [0], [1], [0, 0, 1, 1], [], []>} : vector<8x4xf32>, vector<4x128xf32>, vector<8x128xf32> -> vector<8x128xf32>
    %24 = arith.addf %22, %23 : vector<8x128xf32>
    %cst_21 = arith.constant dense<0.000000e+00> : vector<8x128xf32>
    %25 = tpu.matmul %21, %5, %cst_21 {dimension_numbers = #tpu.dot_dimension_numbers<[1], [0], [0], [1], [0, 0, 1, 1], [], []>} : vector<8x4xf32>, vector<4x128xf32>, vector<8x128xf32> -> vector<8x128xf32>
    %26 = arith.addf %24, %25 : vector<8x128xf32>
    %c1_22 = arith.constant 1 : index
    %c0_23 = arith.constant 0 : index
    %c0_24 = arith.constant 0 : index
    %27 = vector.load %arg4[%c1_22, %c0_23, %c0_24] : memref<2x8x128xf32, #tpu.memory_space<vmem>>, vector<1x8x128xf32>
    %28 = vector.shape_cast %27 : vector<1x8x128xf32> to vector<8x128xf32>
    %29 = vector.shape_cast %26 : vector<8x128xf32> to vector<1x8x128xf32>
    tpu.vector_store %arg4[%c1_22, %c0_23, %c0_24], %29 {strides = array<i32>} : memref<2x8x128xf32, #tpu.memory_space<vmem>>, vector<1x8x128xf32>,
    return
  }
  func.func @transform_0(%arg0: i32, %arg1: i32) -> (i32, i32, i32) {
    %c0_i32 = arith.constant 0 : i32
    %c0_i32_0 = arith.constant 0 : i32
    %c0_i32_1 = arith.constant 0 : i32
    return %arg0, %c0_i32, %c0_i32_0 : i32, i32, i32
  }
  func.func @transform_1(%arg0: i32, %arg1: i32) -> (i32, i32, i32) {
    %c0_i32 = arith.constant 0 : i32
    %c0_i32_0 = arith.constant 0 : i32
    %c0_i32_1 = arith.constant 0 : i32
    return %c0_i32, %c0_i32_0, %arg1 : i32, i32, i32
  }
  func.func @transform_2(%arg0: i32, %arg1: i32) -> (i32, i32, i32) {
    %c0_i32 = arith.constant 0 : i32
    %c0_i32_0 = arith.constant 0 : i32
    return %arg0, %c0_i32, %arg1 : i32, i32, i32
  }
}

</mosaic_0001>

<bundles_post_ra>
// kernel: tpu_custom_call.1
= control target key start
LH: loop header
LB: loop body
LE: loop exit
PB: predicated region body
PF: predicated region fallthrough
CT: control target
= control target key end

     0   :  { %7 = vsyncpa [#allocation3], 0  ;;  %s1125_s0 = inlined_call_operand.vmem [shape: f32[4,8,4], index: 0, kind: input, shape index: {}]   ;;  %s1126_s1 = inlined_call_operand.vmem [shape: f32[3,4,128], index: 1, kind: input, shape index: {}]   ;;  %s1127_s2 = inlined_call_operand.hbm [shape: f32[4,8,128], index: 2, kind: output, shape index: {}]  }
   0x1   :  { %9 = vsyncpa [#allocation3 + $0x1], 0  ;;  %s984_s9 = smov 0   ;;  %s986_s10 = smov 0  }
   0x2   :  { %s988_s11 = smov 0   ;;  %s990_s12 = smov 0  }
   0x3   :  { %s992_s13 = smov 0   ;;  %s994_s14 = smov 0  }
   0x4 LB: > { %s744_s15 = sadd.s32 4294967295, %s962_s14   ;;  %s745_s16 = sadd.s32 4294967294, %s962_s14   ;;  %s962_s14 = sphi %s994_s14, %s15_s14   ;;  %s958_s13 = sphi %s992_s13, %s1134_s13   ;;  %s954_s12 = sphi %s990_s12, %s1133_s12   ;;  %s950_s11 = sphi %s988_s11, %s1132_s11   ;;  %s946_s10 = sphi %s986_s10, %s1131_s10   ;;  %s942_s9 = sphi %s984_s9, %s1130_s9  }
   0x5   : > { %s27_s17 = sadd.s32 1, %s958_s13  ;;  %s88_s18 = sadd.s32 1, %s950_s11 }
   0x6   : > { %p29_p0 = scmp.ge.s32.totalorder %s27_s17, 2  ;;  %p98_p1 = scmp.ne.s32.totalorder %s950_s11, %s946_s10 }
   0x7   : > { %p99_p2 = scmp.eq.s32.totalorder %s744_s15, 1  ;;  %p104_p3 = scmp.ne.s32.totalorder %s946_s10, %s942_s9 }
   0x8   : > { %s1136_s17 = smov (%p29_p0, %s27_s17), 0  ;;  %p105_p5 = scmp.eq.s32.totalorder %s745_s16, 1 }
   0x9   : > { %p1024_p4 = por %p99_p2, %p98_p1  ;;  %s83_s20 = ssub.s32 %s958_s13, %s1136_s17 }
   0xa   : > { %p749_p6 = scmp.ge.s32.totalorder %s962_s14, 1  ;;  %p86_p7 = scmp.eq.s32.totalorder %s83_s20, 0 }
   0xb   : > { %p1031_p8 = por %p105_p5, %p104_p3  ;;  %p139_p9 = scmp.lt.s32.totalorder %s962_s14, 3 }
   0xc   : > { %s1037_s22 = scalar_select %p86_p7, %s950_s11, %s88_s18  }
   0xd   : > { %p140_p10 = pnand %p749_p6, %p139_p9 }
   0xe   : > { %v753_v0 = vld [vmem:[%s1126_s1 + $0x4] sm:$0xf] (!%p140_p10)  ;;  %vm188_vm0 = vcmask (!%p140_p10), 1043456   ;;  %s751_s25 = sshll.u32 (!%p140_p10), %s954_s12, 1  ;;  %v964_v1 = vmov (!%p140_p10), 0.0   ;;  %vm965_vm1 = vmmov (!%p140_p10), 0  }
   0xf   : > { %143 = sbr.rel (%p140_p10) target bundleno = 269 (0x10d), region = 28  ;;  %787 = vmatprep.subr.mxu0 (!%p140_p10), %v964_v1  ;;  %802 = vmatprep.subr.mxu1 (!%p140_p10), %v964_v1  ;;  %p166_p11 = scmp.lt.s32.totalorder (!%p140_p10), %s751_s25, 3  ;;  %vm184_vm2 = vcmask (!%p140_p10), 31744   ;;  %v176_v2 = vld [vmem:[%s1126_s1] sm:$0xf] (!%p140_p10) }
  0x10   : > { %788 = vmatpush3.msk.msra.mxu0 (!%p140_p10), %vm188_vm0, %v753_v0  ;;  %803 = vmatpush3.msk.msra.mxu1 (!%p140_p10), %vm188_vm0, %v753_v0  ;;  %v754_v7 = vld [vmem:[%s1126_s1 + $0x8] sm:$0xf] (!%p140_p10)  ;;  %s162_s6 = sand.u32 (!%p140_p10), 1, %s946_s10   ;;  %s774_s16 = sshll.u32 (!%p140_p10), %s954_s12, 8 }
  0x11   : > { %789 = vmatprep.mubr.msk.f32.mxu0 (!%p140_p10), %vm965_vm1, %v964_v1  ;;  %792 = vmatprep.subr.mxu0 (!%p140_p10), %v964_v1  ;;  %s750_s7 = sshll.u32 (!%p140_p10), %s162_s6, 4  ;;  %s1077_s23 = scalar_lea.hbm (!%p140_p10), %s1127_s2, %s774_s16 }
  0x12   : > { %804 = vmatprep.mubr.msk.f32.mxu1 (!%p140_p10), %vm965_vm1, %v964_v1  ;;  %807 = vmatprep.subr.mxu1 (!%p140_p10), %v964_v1  ;;  %s164_s8 = scalar_lea.vmem (!%p140_p10), [#allocation2], %s750_s7  ;;  %s1079_s24 = scalar_lea.sflag (!%p140_p10), [#allocation3], %s162_s6 }
  0x13   : > { %s657_s15 = sshll.u32 (!%p140_p10), %s164_s8, 4  ;;  %s966_s12 = smov (!%p140_p10), [#allocation2]   ;;  %s1072_s15 = int_to_ptr.vmem [resolvable:$true] %s657_s15 }
  0x16   : > { %s1138_s25 = smov (!%p166_p11, %s751_s25), 3 }
  0x17   : > { %s752_s26 = sshll.u32 %s1138_s25, 3  ;;  %s884_s25 = scalar_lea.vmem %s1072_s15, 256 }
  0x18   : > { %s169_s29 = scalar_lea.vmem %s1125_s0, %s752_s26  ;;  %p885_p12 = scmp.ne.s32.totalorder %s1072_s15, %s884_s25 }
  0x19   : > { %v181_v3 = vld [vmem:[%s169_s29] sm:$0xff]  ;;  %v761_v4 = vld [vmem:[%s169_s29 + $0x8] sm:$0xff]  ;;  %s888_s26 = sshll.u32 %s966_s12, 4  ;;  %s889_s26 = int_to_ptr.vmem [resolvable:$false] %s888_s26 }
  0x1a   : > { %790 = vmatmul.mubr.msk.f32.vlgmr.msra.gmra.mrb[0].mxu0 %vm184_vm2, %v181_v3  ;;  %805 = vmatmul.mubr.msk.f32.vlgmr.msra.gmra.mrb[0].mxu1 %vm184_vm2, %v761_v4  ;;  %v182_v5 = vrot.slane %v181_v3, 7  ;;  %v418_v6 = vrot.slane %v761_v4, 7  ;;  %v183_v8 = vrot.slane %v181_v3, 1  ;;  %v419_v9 = vrot.slane %v761_v4, 1  ;;  %p886_p13 = pnand %p885_p12, %p1024_p4  ;;  %s890_s27 = scalar_lea.vmem %s889_s26, 512 }
  0x1b   : > { %793 = vmatpush3.msk.msra.mxu0 %vm188_vm0, %v176_v2  ;;  %808 = vmatpush3.msk.msra.mxu1 %vm188_vm0, %v176_v2  ;;  %p891_p1 = scmp.lt.s32.totalorder %s1072_s15, %s889_s26  ;;  %p892_p2 = scmp.lt.s32.totalorder %s890_s27, %s884_s25 }
  0x1c   : > { %794 = vmatprep.mubr.msk.f32.mxu0 %vm965_vm1, %v964_v1  ;;  %797 = vmatprep.subr.mxu0 %v964_v1  ;;  %p887_p0 = pneg %p886_p13 }
  0x1d   : > { %809 = vmatprep.mubr.msk.f32.mxu1 %vm965_vm1, %v964_v1  ;;  %812 = vmatprep.subr.mxu1 %v964_v1  ;;  %p893_p3 = por %p892_p2, %p891_p1 }
  0x1f   : > { %p894_p5 = pnand %p893_p3, %p887_p0 }
  0x22   : > { %795 = vmatmul.mubr.msk.f32.vlgmr.msra.gmra.mrb[0].mxu0 %vm184_vm2, %v182_v5  ;;  %810 = vmatmul.mubr.msk.f32.vlgmr.msra.gmra.mrb[0].mxu1 %vm184_vm2, %v418_v6 }
  0x23   : > { %798 = vmatpush3.msk.msra.mxu0 %vm188_vm0, %v754_v7  ;;  %813 = vmatpush3.msk.msra.mxu1 %vm188_vm0, %v754_v7 }
  0x24   : > { %799 = vmatprep.mubr.msk.f32.mxu0 %vm965_vm1, %v964_v1  ;;  %814 = vmatprep.mubr.msk.f32.mxu1 %vm965_vm1, %v964_v1 }
  0x2a   : > { %800 = vmatmul.mubr.msk.f32.vlgmr.msra.gmra.mrb[0].mxu0 %vm184_vm2, %v183_v8  ;;  %815 = vmatmul.mubr.msk.f32.vlgmr.msra.gmra.mrb[0].mxu1 %vm184_vm2, %v419_v9 }
  0xfd   : > { %v410_v10 = vpop.f32.mrb[0].mxu0  ;;  %v635_v11 = vpop.f32.mrb[0].mxu1 }
  0xfe   : > { %415 = vst [vmem:[%s164_s8] sm:$0xff] %v410_v10  ;;  %768 = vst [vmem:[%s164_s8 + $0x8] sm:$0xff] %v635_v11  ;;  %v801_v12 = vpop.f32.mrb[1].mxu0  ;;  %v816_v13 = vpop.f32.mrb[1].mxu1 }
  0xff   : > { %897 = shalt.err (!%p894_p5)
}
 0x100   : > { %s898_s28 = scalar_lea.hbm %s1077_s23, 256  ;;  %s902_s3 = scalar_lea.hbm %s1127_s2, 512 }
 0x101   : > { %p899_p6 = scmp.ne.s32.totalorder %s1077_s23, %s898_s28  ;;  %p903_p10 = scmp.lt.u32.totalorder %s1077_s23, %s1127_s2 }
 0x102   : > { %p904_p11 = scmp.lt.u32.totalorder %s902_s3, %s898_s28  ;;  %p906_p13 = scmp.lt.u32.totalorder %s898_s28, %s1077_s23 }
 0x103   : > { %p900_p7 = pnand %p899_p6, %p1024_p4 }
 0x104   : > { %p905_p12 = por %p904_p11, %p903_p10 }
 0x105   : > { %p901_p9 = pneg %p900_p7 }
 0x106   : > { %p907_p0 = por %p906_p13, %p905_p12 }
 0x108   : > { %p908_p1 = pnand %p907_p0, %p901_p9 }
 0x10a   : > { %911 = shalt.err (!%p908_p1)
}
 0x10b   : > { %s967_s6 = smov 128   ;;  %s968_s7 = smov 8  }
 0x10c   : > { %825 = dma.vmem_to_hbm [thread:$0]  (%p1024_p4), %s1072_s15, 256, %s1077_s23, %s1079_s24, %s967_s6, %s967_s6, %s968_s7  }
 0x10d PF: > { %p831_p2 = scmp.ge.s32.totalorder %s962_s14, 2  ;;  %s672_s8 = sand.u32 1, %s942_s9  }
 0x10e   : > { %s673_s16 = scalar_lea.sflag [#allocation3], %s672_s8 }
 0x10f   : > { %p828_p3 = pnand %p831_p2, %p1031_p8 }
 0x111   : > { %937 = dma.done.wait (!%p828_p3), %s673_s16, 256  }
 0x112   : > { %939 = vsyncadd (!%p828_p3), %s673_s16, 4294967040  ;;  %s15_s14 = sadd.s32 1, %s962_s14   ;;  %s1130_s9 = smov %s946_s10 }
 0x113   : > { %p12_p5 = scmp.ge.s32.totalorder %s15_s14, 4   ;;  %s1131_s10 = smov %s950_s11 }
 0x114   : > { %s1132_s11 = smov %s1037_s22  ;;  %s1133_s12 = smov %s958_s13 }
 0x115   : > { %s1134_s13 = smov %s1136_s17  ;;  %14 = sbr.rel (!%p12_p5) target bundleno = 4 (0x4), region = 70 }
 0x11c   :  { %678 = vsyncpa [#allocation3], 1 }
 0x11d   :  { %680 = vsyncpa [#allocation3 + $0x1], 1 }

</bundles_post_ra>
